<compile_context>
chip_gen: v7x
topology: tpu7x:2x2x1
jax: 0.10.0
libtpu: 0.0.40
codegen_flags: <defaults>
</compile_context>

<pallas_src>
import functools

import jax
import jax.numpy as jnp
from jax.experimental import pallas as pl
from jax.experimental.pallas import tpu as pltpu


def _round_up(x, m):
    return ((x + m - 1) // m) * m


def _cdiv(a, b):
    return -(-a // b)


def _ffn_kernel(x_ref, w1_ref, b1_ref, w2_ref, b2_ref, g_ref, bt_ref,
                o_ref, acc_ref, *, eps, d_in_true, mxu_dtype):
    k = pl.program_id(1)

    @pl.when(k == 0)
    def _():
        acc_ref[...] = jnp.zeros_like(acc_ref)

    x = x_ref[...]                                            # (tm, d_in_pad), native dtype

    # --- hot path: two MXU matmuls (mxu_dtype operands, f32 accumulation) ---
    h = jnp.dot(x.astype(mxu_dtype), w1_ref[...],
                preferred_element_type=jnp.float32)           # (tm, tk) f32
    h = jnp.maximum(h + b1_ref[...].astype(jnp.float32), 0.0)  # relu on the VPU
    acc_ref[...] += jnp.dot(h.astype(mxu_dtype), w2_ref[...],
                            preferred_element_type=jnp.float32)

    @pl.when(k == pl.num_programs(1) - 1)
    def _():
        # dropout: inference mode -> identity
        # residual add in f32 with the original-precision x
        y = acc_ref[...] + b2_ref[...].astype(jnp.float32) + x.astype(jnp.float32)

        # LayerNorm over the TRUE d_in (padded lanes are exactly 0 before centering
        # and are masked out of the variance). eps inside sqrt, biased variance,
        # matching PyTorch nn.LayerNorm(eps=1e-6).
        inv_n = 1.0 / d_in_true
        mean = jnp.sum(y, axis=-1, keepdims=True) * inv_n
        c = y - mean
        if y.shape[-1] != d_in_true:
            lane = jax.lax.broadcasted_iota(jnp.int32, c.shape, 1)
            c = jnp.where(lane < d_in_true, c, 0.0)
        var = jnp.sum(c * c, axis=-1, keepdims=True) * inv_n
        inv = jax.lax.rsqrt(var + eps)
        o_ref[...] = (c * inv * g_ref[...].astype(jnp.float32)
                      + bt_ref[...].astype(jnp.float32)).astype(o_ref.dtype)


def _vmem_limit_bytes(tm, tk, d_in_pad, x_itemsize, w_itemsize):
    """Generation-gated VMEM plan: double-buffered x/out tiles and W1/W2 chunks,
    single-buffered small constants, f32 accumulator + h intermediate, 1.5x margin,
    capped at ~80% of physical VMEM (queried per chip generation)."""
    io = 2 * tm * d_in_pad * (x_itemsize + x_itemsize)            # x + out, 2 buffers each
    wts = 2 * 2 * d_in_pad * tk * w_itemsize                      # W1/W2 chunks, 2 buffers
    small = 2 * tk * 4 + 3 * d_in_pad * 4                         # b1 chunk + b2/gamma/beta
    acc = tm * d_in_pad * 4                                       # f32 accumulator scratch
    h = tm * tk * 4                                               # f32 hidden intermediate
    total = io + wts + small + acc + h
    try:
        cap = pltpu.get_tpu_info().vmem_capacity_bytes
    except Exception:
        cap = 64 << 20                                            # conservative (v7x physical)
    return int(min(max(int(1.5 * total), 16 << 20), int(0.8 * cap)))


@functools.partial(jax.jit, static_argnames=("tm", "tk_hid", "eps", "mxu_dtype"))
def positioned_feed_forward(x, w1, b1, w2, b2, gamma, beta, *,
                            tm=512, tk_hid=512, eps=1e-6, mxu_dtype=jnp.bfloat16):
    """x: (batch, seq, d_in). Returns same shape/dtype."""
    B, S, d_in = x.shape
    d_hid = w1.shape[1]
    M = B * S

    # ---- padded / tiled sizes ----
    d_in_pad = _round_up(d_in, 128)                 # lane-dense output + full-vreg LN reduce
    d_hid128 = _round_up(d_hid, 128)
    tk = min(tk_hid, d_hid128)                      # hidden-chunk width
    d_hid_pad = _round_up(d_hid128, tk)
    nk = d_hid_pad // tk

    M_pad = _round_up(M, 8)                         # pad rows only to sublane multiple
    # cap tm so the "parallel" row axis has >= 2 steps (lets v7x split across 2 TCs)
    tm_eff = min(tm, _round_up(max(_cdiv(M_pad, 2), 8), 8))
    n_rows = _cdiv(M_pad, tm_eff)                   # ragged last block handled by Pallas

    mxu_dt = mxu_dtype if mxu_dtype is not None else w1.dtype

    # ---- wrapper-side casts / padding (weights cast to the MXU dtype ONCE here) ----
    w1c = w1.astype(mxu_dt)
    w2c = w2.astype(mxu_dt)
    if (d_in_pad != d_in) or (d_hid_pad != d_hid):
        w1c = jnp.pad(w1c, ((0, d_in_pad - d_in), (0, d_hid_pad - d_hid)))
        w2c = jnp.pad(w2c, ((0, d_hid_pad - d_hid), (0, d_in_pad - d_in)))

    x2 = x.reshape(M, d_in)
    if (M_pad != M) or (d_in_pad != d_in):
        x2 = jnp.pad(x2, ((0, M_pad - M), (0, d_in_pad - d_in)))

    b1p = jnp.pad(b1, (0, d_hid_pad - d_hid)).reshape(1, d_hid_pad)
    b2p = jnp.pad(b2, (0, d_in_pad - d_in)).reshape(1, d_in_pad)
    gp = jnp.pad(gamma, (0, d_in_pad - d_in)).reshape(1, d_in_pad)
    btp = jnp.pad(beta, (0, d_in_pad - d_in)).reshape(1, d_in_pad)

    kernel = functools.partial(_ffn_kernel, eps=eps, d_in_true=d_in, mxu_dtype=mxu_dt)

    w_item = jnp.dtype(mxu_dt).itemsize
    x_item = jnp.dtype(x.dtype).itemsize
    cost = pl.CostEstimate(
        flops=4 * M_pad * d_in_pad * d_hid_pad,
        transcendentals=M_pad,
        bytes_accessed=(2 * M_pad * d_in_pad * x_item
                        + n_rows * 2 * d_in_pad * d_hid_pad * w_item),
    )

    out = pl.pallas_call(
        kernel,
        out_shape=jax.ShapeDtypeStruct((M_pad, d_in_pad), x.dtype),
        grid_spec=pltpu.PrefetchScalarGridSpec(
            num_scalar_prefetch=0,
            grid=(n_rows, nk),                       # rows "parallel", hidden chunks last
            in_specs=[
                pl.BlockSpec((tm_eff, d_in_pad), lambda i, k: (i, 0)),    # x rows
                pl.BlockSpec((d_in_pad, tk), lambda i, k: (0, k)),        # W1 chunk
                pl.BlockSpec((1, tk), lambda i, k: (0, k)),               # b1 chunk
                pl.BlockSpec((tk, d_in_pad), lambda i, k: (k, 0)),        # W2 chunk
                pl.BlockSpec((1, d_in_pad), lambda i, k: (0, 0),          # b2 (constant)
                             pipeline_mode=pl.Buffered(1)),
                pl.BlockSpec((1, d_in_pad), lambda i, k: (0, 0),          # gamma (constant)
                             pipeline_mode=pl.Buffered(1)),
                pl.BlockSpec((1, d_in_pad), lambda i, k: (0, 0),          # beta (constant)
                             pipeline_mode=pl.Buffered(1)),
            ],
            out_specs=pl.BlockSpec((tm_eff, d_in_pad), lambda i, k: (i, 0)),
            scratch_shapes=[pltpu.VMEM((tm_eff, d_in_pad), jnp.float32)],  # accumulator
        ),
        compiler_params=pltpu.CompilerParams(
            dimension_semantics=("parallel", "arbitrary"),
            vmem_limit_bytes=_vmem_limit_bytes(tm_eff, tk, d_in_pad, x_item, w_item),
        ),
        cost_estimate=cost,
    )(x2, w1c, b1p, w2c, b2p, gp, btp)

    return out[:M, :d_in].reshape(B, S, d_in)


def _reference(x, w1, b1, w2, b2, gamma, beta, eps=1e-6):
    hp = jax.lax.Precision.HIGHEST
    h = jnp.maximum(jnp.dot(x, w1, precision=hp) + b1, 0.0)
    y = jnp.dot(h, w2, precision=hp) + b2 + x
    mu = y.mean(-1, keepdims=True)
    var = ((y - mu) ** 2).mean(-1, keepdims=True)
    return (y - mu) / jnp.sqrt(var + eps) * gamma + beta


if __name__ == "__main__":
    # small shapes consistent with the module: (batch, seq, d_in), hidden=d_hid
    B, S, d_in, d_hid = 2, 8, 32, 64

    key = jax.random.PRNGKey(0)
    kx, kw1, kb1, kw2, kb2 = jax.random.split(key, 5)

    x = jax.random.normal(kx, (B, S, d_in), dtype=jnp.float32)

    # deterministic param init (uniform ~ nn.Linear default scale)
    lim1 = 1.0 / (d_in ** 0.5)
    lim2 = 1.0 / (d_hid ** 0.5)
    w1 = jax.random.uniform(kw1, (d_in, d_hid), jnp.float32, -lim1, lim1)
    b1 = jax.random.uniform(kb1, (d_hid,), jnp.float32, -lim1, lim1)
    w2 = jax.random.uniform(kw2, (d_hid, d_in), jnp.float32, -lim2, lim2)
    b2 = jax.random.uniform(kb2, (d_in,), jnp.float32, -lim2, lim2)
    gamma = jnp.ones((d_in,), jnp.float32)    # LayerNorm weight init
    beta = jnp.zeros((d_in,), jnp.float32)    # LayerNorm bias init

    ref = _reference(x, w1, b1, w2, b2, gamma, beta)

    # 1) f32 MXU feed: tight tolerance
    out_f32 = positioned_feed_forward(x, w1, b1, w2, b2, gamma, beta,
                                      mxu_dtype=jnp.float32)
    jax.block_until_ready(out_f32)
    assert out_f32.shape == x.shape and out_f32.dtype == x.dtype
    assert jnp.allclose(out_f32, ref, atol=1e-4, rtol=1e-4)

    # 2) default bf16 MXU feed (f32 accumulation): looser tolerance
    out_bf16 = positioned_feed_forward(x, w1, b1, w2, b2, gamma, beta)
    jax.block_until_ready(out_bf16)
    assert jnp.allclose(out_bf16, ref, atol=5e-2, rtol=5e-2)

    # 3) ragged row count exercising the cdiv-grid masked last block (M = 14)
    x_odd = x[:, :7, :]
    out_odd = positioned_feed_forward(x_odd, w1, b1, w2, b2, gamma, beta,
                                      mxu_dtype=jnp.float32)
    jax.block_until_ready(out_odd)
    ref_odd = _reference(x_odd, w1, b1, w2, b2, gamma, beta)
    assert jnp.allclose(out_odd, ref_odd, atol=1e-4, rtol=1e-4)

    print("KERNEL_OK")
</pallas_src>

<mosaic_0001>
module attributes {stable_mosaic.version = 11 : i64} {
  func.func @_ffn_kernel(%arg0: i32, %arg1: i32, %arg2: memref<8x128xf32, #tpu.memory_space<vmem>>, %arg3: memref<128x128xf32, #tpu.memory_space<vmem>>, %arg4: memref<1x128xf32, #tpu.memory_space<vmem>>, %arg5: memref<128x128xf32, #tpu.memory_space<vmem>>, %arg6: memref<1x128xf32, #tpu.memory_space<vmem>>, %arg7: memref<1x128xf32, #tpu.memory_space<vmem>>, %arg8: memref<1x128xf32, #tpu.memory_space<vmem>>, %arg9: memref<8x128xf32, #tpu.memory_space<vmem>>, %arg10: memref<8x128xf32, #tpu.memory_space<vmem>>) attributes {dimension_semantics = [#tpu.dimension_semantics<parallel>, #tpu.dimension_semantics<arbitrary>], iteration_bounds = array<i64: 2, 1>, scalar_prefetch = 0 : i64, scratch_operands = 1 : i64, tpu.core_type = #tpu.core_type<tc>, window_params = [{transform_indices = @transform_0, window_bounds = array<i64: 8, 128>}, {transform_indices = @transform_1, window_bounds = array<i64: 128, 128>}, {transform_indices = @transform_2, window_bounds = array<i64: 1, 128>}, {transform_indices = @transform_3, window_bounds = array<i64: 128, 128>}, {pipeline_mode = #tpu.pipeline_mode<synchronous>, transform_indices = @transform_4, window_bounds = array<i64: 1, 128>}, {pipeline_mode = #tpu.pipeline_mode<synchronous>, transform_indices = @transform_5, window_bounds = array<i64: 1, 128>}, {pipeline_mode = #tpu.pipeline_mode<synchronous>, transform_indices = @transform_6, window_bounds = array<i64: 1, 128>}, {transform_indices = @transform_7, window_bounds = array<i64: 8, 128>}]} {
    %c0_i32 = arith.constant 0 : i32
    %0 = arith.cmpi eq, %arg1, %c0_i32 : i32
    %1 = arith.extui %0 : i1 to i32
    %c0_i32_0 = arith.constant 0 : i32
    %2 = arith.cmpi ne, %1, %c0_i32_0 : i32
    scf.if %2 {
      %cst_16 = arith.constant 0.000000e+00 : f32
      %19 = vector.broadcast %cst_16 : f32 to vector<8x128xf32>
      %c0_17 = arith.constant 0 : index
      %c0_18 = arith.constant 0 : index
      %20 = vector.load %arg10[%c0_17, %c0_18] : memref<8x128xf32, #tpu.memory_space<vmem>>, vector<8x128xf32>
      tpu.vector_store %arg10[%c0_17, %c0_18], %19 {strides = array<i32>} : memref<8x128xf32, #tpu.memory_space<vmem>>, vector<8x128xf32>,
    } else {
    }
    %c0 = arith.constant 0 : index
    %c0_1 = arith.constant 0 : index
    %3 = vector.load %arg2[%c0, %c0_1] : memref<8x128xf32, #tpu.memory_space<vmem>>, vector<8x128xf32>
    %c0_2 = arith.constant 0 : index
    %c0_3 = arith.constant 0 : index
    %4 = vector.load %arg3[%c0_2, %c0_3] : memref<128x128xf32, #tpu.memory_space<vmem>>, vector<128x128xf32>
    %cst = arith.constant dense<0.000000e+00> : vector<8x128xf32>
    %5 = tpu.matmul %3, %4, %cst {dimension_numbers = #tpu.dot_dimension_numbers<[1], [0], [0], [1], [0, 0, 1, 1], [], []>} : vector<8x128xf32>, vector<128x128xf32>, vector<8x128xf32> -> vector<8x128xf32>
    %c0_4 = arith.constant 0 : index
    %c0_5 = arith.constant 0 : index
    %6 = vector.load %arg4[%c0_4, %c0_5] : memref<1x128xf32, #tpu.memory_space<vmem>>, vector<1x128xf32>
    %7 = vector.broadcast %6 : vector<1x128xf32> to vector<8x128xf32>
    %8 = arith.addf %5, %7 : vector<8x128xf32>
    %cst_6 = arith.constant 0.000000e+00 : f32
    %9 = vector.broadcast %cst_6 : f32 to vector<8x128xf32>
    %10 = arith.maximumf %8, %9 : vector<8x128xf32>
    %c0_7 = arith.constant 0 : index
    %c0_8 = arith.constant 0 : index
    %11 = vector.load %arg10[%c0_7, %c0_8] : memref<8x128xf32, #tpu.memory_space<vmem>>, vector<8x128xf32>
    %c0_9 = arith.constant 0 : index
    %c0_10 = arith.constant 0 : index
    %12 = vector.load %arg5[%c0_9, %c0_10] : memref<128x128xf32, #tpu.memory_space<vmem>>, vector<128x128xf32>
    %cst_11 = arith.constant dense<0.000000e+00> : vector<8x128xf32>
    %13 = tpu.matmul %10, %12, %cst_11 {dimension_numbers = #tpu.dot_dimension_numbers<[1], [0], [0], [1], [0, 0, 1, 1], [], []>} : vector<8x128xf32>, vector<128x128xf32>, vector<8x128xf32> -> vector<8x128xf32>
    %14 = arith.addf %11, %13 : vector<8x128xf32>
    %c0_12 = arith.constant 0 : index
    %c0_13 = arith.constant 0 : index
    %15 = vector.load %arg10[%c0_12, %c0_13] : memref<8x128xf32, #tpu.memory_space<vmem>>, vector<8x128xf32>
    tpu.vector_store %arg10[%c0_12, %c0_13], %14 {strides = array<i32>} : memref<8x128xf32, #tpu.memory_space<vmem>>, vector<8x128xf32>,
    %c0_i32_14 = arith.constant 0 : i32
    %16 = arith.cmpi eq, %arg1, %c0_i32_14 : i32
    %17 = arith.extui %16 : i1 to i32
    %c0_i32_15 = arith.constant 0 : i32
    %18 = arith.cmpi ne, %17, %c0_i32_15 : i32
    scf.if %18 {
      %c0_16 = arith.constant 0 : index
      %c0_17 = arith.constant 0 : index
      %19 = vector.load %arg10[%c0_16, %c0_17] : memref<8x128xf32, #tpu.memory_space<vmem>>, vector<8x128xf32>
      %c0_18 = arith.constant 0 : index
      %c0_19 = arith.constant 0 : index
      %20 = vector.load %arg6[%c0_18, %c0_19] : memref<1x128xf32, #tpu.memory_space<vmem>>, vector<1x128xf32>
      %21 = vector.broadcast %20 : vector<1x128xf32> to vector<8x128xf32>
      %22 = arith.addf %19, %21 : vector<8x128xf32>
      %23 = arith.addf %22, %3 : vector<8x128xf32>
      %cst_20 = arith.constant dense<0.000000e+00> : vector<8xf32>
      %24 = vector.multi_reduction <add>, %23, %cst_20 [1] : vector<8x128xf32> to vector<8xf32>
      %25 = vector.shape_cast %24 : vector<8xf32> to vector<8x1xf32>
      %cst_21 = arith.constant 3.125000e-02 : f32
      %26 = vector.broadcast %cst_21 : f32 to vector<8x1xf32>
      %27 = arith.mulf %25, %26 : vector<8x1xf32>
      %28 = vector.broadcast %27 : vector<8x1xf32> to vector<8x128xf32>
      %29 = arith.subf %23, %28 : vector<8x128xf32>
      %30 = tpu.iota {dimensions = array<i32: 1>} : vector<8x128xi32>
      %c32_i32 = arith.constant 32 : i32
      %31 = vector.broadcast %c32_i32 : i32 to vector<8x128xi32>
      %32 = arith.cmpi slt, %30, %31 : vector<8x128xi32>
      %cst_22 = arith.constant 0.000000e+00 : f32
      %33 = vector.broadcast %cst_22 : f32 to vector<8x128xf32>
      %34 = arith.select %32, %29, %33 : vector<8x128xi1>, vector<8x128xf32>
      %35 = arith.mulf %34, %34 : vector<8x128xf32>
      %cst_23 = arith.constant dense<0.000000e+00> : vector<8xf32>
      %36 = vector.multi_reduction <add>, %35, %cst_23 [1] : vector<8x128xf32> to vector<8xf32>
      %37 = vector.shape_cast %36 : vector<8xf32> to vector<8x1xf32>
      %cst_24 = arith.constant 3.125000e-02 : f32
      %38 = vector.broadcast %cst_24 : f32 to vector<8x1xf32>
      %39 = arith.mulf %37, %38 : vector<8x1xf32>
      %cst_25 = arith.constant 9.99999997E-7 : f32
      %40 = vector.broadcast %cst_25 : f32 to vector<8x1xf32>
      %41 = arith.addf %39, %40 : vector<8x1xf32>
      %42 = math.rsqrt %41 : vector<8x1xf32>
      %43 = vector.broadcast %42 : vector<8x1xf32> to vector<8x128xf32>
      %44 = arith.mulf %34, %43 : vector<8x128xf32>
      %c0_26 = arith.constant 0 : index
      %c0_27 = arith.constant 0 : index
      %45 = vector.load %arg7[%c0_26, %c0_27] : memref<1x128xf32, #tpu.memory_space<vmem>>, vector<1x128xf32>
      %46 = vector.broadcast %45 : vector<1x128xf32> to vector<8x128xf32>
      %47 = arith.mulf %44, %46 : vector<8x128xf32>
      %c0_28 = arith.constant 0 : index
      %c0_29 = arith.constant 0 : index
      %48 = vector.load %arg8[%c0_28, %c0_29] : memref<1x128xf32, #tpu.memory_space<vmem>>, vector<1x128xf32>
      %49 = vector.broadcast %48 : vector<1x128xf32> to vector<8x128xf32>
      %50 = arith.addf %47, %49 : vector<8x128xf32>
      %c0_30 = arith.constant 0 : index
      %c0_31 = arith.constant 0 : index
      %51 = vector.load %arg9[%c0_30, %c0_31] : memref<8x128xf32, #tpu.memory_space<vmem>>, vector<8x128xf32>
      tpu.vector_store %arg9[%c0_30, %c0_31], %50 {strides = array<i32>} : memref<8x128xf32, #tpu.memory_space<vmem>>, vector<8x128xf32>,
    } else {
    }
    return
  }
  func.func @transform_0(%arg0: i32, %arg1: i32) -> (i32, i32) {
    %c0_i32 = arith.constant 0 : i32
    %c0_i32_0 = arith.constant 0 : i32
    return %arg0, %c0_i32 : i32, i32
  }
  func.func @transform_1(%arg0: i32, %arg1: i32) -> (i32, i32) {
    %c0_i32 = arith.constant 0 : i32
    %c0_i32_0 = arith.constant 0 : i32
    return %c0_i32, %arg1 : i32, i32
  }
  func.func @transform_2(%arg0: i32, %arg1: i32) -> (i32, i32) {
    %c0_i32 = arith.constant 0 : i32
    %c0_i32_0 = arith.constant 0 : i32
    return %c0_i32, %arg1 : i32, i32
  }
  func.func @transform_3(%arg0: i32, %arg1: i32) -> (i32, i32) {
    %c0_i32 = arith.constant 0 : i32
    %c0_i32_0 = arith.constant 0 : i32
    return %arg1, %c0_i32 : i32, i32
  }
  func.func @transform_4(%arg0: i32, %arg1: i32) -> (i32, i32) {
    %c0_i32 = arith.constant 0 : i32
    %c0_i32_0 = arith.constant 0 : i32
    %c0_i32_1 = arith.constant 0 : i32
    return %c0_i32, %c0_i32_0 : i32, i32
  }
  func.func @transform_5(%arg0: i32, %arg1: i32) -> (i32, i32) {
    %c0_i32 = arith.constant 0 : i32
    %c0_i32_0 = arith.constant 0 : i32
    %c0_i32_1 = arith.constant 0 : i32
    return %c0_i32, %c0_i32_0 : i32, i32
  }
  func.func @transform_6(%arg0: i32, %arg1: i32) -> (i32, i32) {
    %c0_i32 = arith.constant 0 : i32
    %c0_i32_0 = arith.constant 0 : i32
    %c0_i32_1 = arith.constant 0 : i32
    return %c0_i32, %c0_i32_0 : i32, i32
  }
  func.func @transform_7(%arg0: i32, %arg1: i32) -> (i32, i32) {
    %c0_i32 = arith.constant 0 : i32
    %c0_i32_0 = arith.constant 0 : i32
    return %arg0, %c0_i32 : i32, i32
  }
}

</mosaic_0001>

<bundles_post_ra>
// kernel: positioned_feed_forward.1
= control target key start
LH: loop header
LB: loop body
LE: loop exit
PB: predicated region body
PF: predicated region fallthrough
CT: control target
= control target key end

     0   :  { %s941_s24 = smov 0   ;;  %s943_s25 = smov 0   ;;  %s1109_s0 = inlined_call_operand.vmem [shape: f32[16,128], index: 0, kind: input, shape index: {}]   ;;  %s1110_s1 = inlined_call_operand.vmem [shape: f32[128,128], index: 1, kind: input, shape index: {}]   ;;  %s1111_s2 = inlined_call_operand.vmem [shape: f32[1,128], index: 2, kind: input, shape index: {}]   ;;  %s1112_s3 = inlined_call_operand.vmem [shape: f32[128,128], index: 3, kind: input, shape index: {}]   ;;  %s1113_s4 = inlined_call_operand.vmem [shape: f32[1,128], index: 4, kind: input, shape index: {}]   ;;  %s1114_s5 = inlined_call_operand.vmem [shape: f32[1,128], index: 5, kind: input, shape index: {}]   ;;  %s1115_s6 = inlined_call_operand.vmem [shape: f32[1,128], index: 6, kind: input, shape index: {}]   ;;  %s1116_s7 = inlined_call_operand.vmem [shape: f32[16,128], index: 7, kind: output, shape index: {}]  }
   0x1   :  { %s945_s26 = smov 0  }
   0x2 LB: > { %s29_s27 = sadd.s32 1, %s892_s25  ;;  %p684_p0 = scmp.ge.s32.totalorder %s896_s26, 1  ;;  %s896_s26 = sphi %s945_s26, %s17_s26   ;;  %s892_s25 = sphi %s943_s25, %s1118_s25   ;;  %s888_s24 = sphi %s941_s24, %s1117_s24  }
   0x3   : > { %p31_p1 = scmp.ge.s32.totalorder %s29_s27, 2  ;;  %p276_p2 = scmp.lt.s32.totalorder %s896_s26, 3 }
   0x5   : > { %s1120_s27 = smov (%p31_p1, %s29_s27), 0  ;;  %p277_p3 = pnand %p684_p0, %p276_p2 }
   0x6   : > { %v345_v0 = vld [vmem:[%s1110_s1] sm:$0xff] (!%p277_p3)  ;;  %v346_v1 = vld [vmem:[%s1110_s1 + $0x8] sm:$0xff] (!%p277_p3)  ;;  %v347_v2 = vld [vmem:[%s1110_s1 + $0x10] sm:$0xff] (!%p277_p3)  ;;  %v898_v3 = vmov (!%p277_p3), 0.0|0.0   ;;  %vm899_vm0 = vmmov (!%p277_p3), 0   ;;  %v900_v6 = vmov (!%p277_p3), 0.0   ;;  %v545_v61 = vlaneseq (!%p277_p3) }
   0x7   : > { %280 = sbr.rel (%p277_p3) target bundleno = 785 (0x311), region = 48  ;;  %797 = vmatprep.subr.bf16.mxu0 (!%p277_p3), %v898_v3  ;;  %v798_v4 = vpack.c.bf16 (!%p277_p3), %v346_v1, %v345_v0  ;;  %v348_v5 = vld [vmem:[%s1110_s1 + $0x18] sm:$0xff] (!%p277_p3)  ;;  %759 = vmatprep.mubr.msk.f32.mxu0 (!%p277_p3), %vm899_vm0, %v900_v6  ;;  %v349_v8 = vld [vmem:[%s1110_s1 + $0x20] sm:$0xff] (!%p277_p3)  ;;  %v350_v9 = vld [vmem:[%s1110_s1 + $0x28] sm:$0xff] (!%p277_p3)  ;;  %p318_p4 = scmp.lt.s32.totalorder (!%p277_p3), %s888_s24, 1 }
   0x8   : > { %821 = vmatprep.subr.bf16.mxu1 (!%p277_p3), %v898_v3  ;;  %794 = vmatprep.mubr.msk.f32.mxu1 (!%p277_p3), %vm899_vm0, %v900_v6  ;;  %v801_v7 = vpack.c.bf16 (!%p277_p3), %v348_v5, %v347_v2  ;;  %v440_v10 = vld [vmem:[%s1112_s3] sm:$0xff] (!%p277_p3)  ;;  %v441_v11 = vld [vmem:[%s1112_s3 + $0x8] sm:$0xff] (!%p277_p3)  ;;  %v442_v13 = vld [vmem:[%s1112_s3 + $0x10] sm:$0xff] (!%p277_p3)  ;;  %v804_v15 = vpack.c.bf16 (!%p277_p3), %v350_v9, %v349_v8  ;;  %v546_v62 = vand.u32 (!%p277_p3), 127, %v545_v61 }
   0x9   : > { %799 = vmatpush3.bf16.msra.mxu0 (!%p277_p3), %v798_v4  ;;  %v822_v12 = vpack.c.bf16 (!%p277_p3), %v441_v11, %v440_v10  ;;  %v443_v14 = vld [vmem:[%s1112_s3 + $0x18] sm:$0xff] (!%p277_p3)  ;;  %v351_v16 = vld [vmem:[%s1110_s1 + $0x30] sm:$0xff] (!%p277_p3)  ;;  %v444_v19 = vld [vmem:[%s1112_s3 + $0x20] sm:$0xff] (!%p277_p3) }
   0xa   : > { %800 = vmatprep.subr.bf16.mxu0 (!%p277_p3), %v898_v3  ;;  %v352_v17 = vld [vmem:[%s1110_s1 + $0x38] sm:$0xff] (!%p277_p3)  ;;  %v825_v18 = vpack.c.bf16 (!%p277_p3), %v443_v14, %v442_v13  ;;  %v445_v20 = vld [vmem:[%s1112_s3 + $0x28] sm:$0xff] (!%p277_p3)  ;;  %v353_v22 = vld [vmem:[%s1110_s1 + $0x40] sm:$0xff] (!%p277_p3)  ;;  %vm547_vm1 = vcmp.lt.s32.totalorder (!%p277_p3), %v546_v62, 32 }
   0xb   : > { %823 = vmatpush3.bf16.msra.mxu1 (!%p277_p3), %v822_v12  ;;  %v807_v21 = vpack.c.bf16 (!%p277_p3), %v352_v17, %v351_v16  ;;  %v354_v23 = vld [vmem:[%s1110_s1 + $0x48] sm:$0xff] (!%p277_p3)  ;;  %v828_v24 = vpack.c.bf16 (!%p277_p3), %v445_v20, %v444_v19  ;;  %v446_v25 = vld [vmem:[%s1112_s3 + $0x30] sm:$0xff] (!%p277_p3)  ;;  %v447_v26 = vld [vmem:[%s1112_s3 + $0x38] sm:$0xff] (!%p277_p3) }
   0xc   : > { %824 = vmatprep.subr.bf16.mxu1 (!%p277_p3), %v898_v3  ;;  %v810_v27 = vpack.c.bf16 (!%p277_p3), %v354_v23, %v353_v22  ;;  %v355_v28 = vld [vmem:[%s1110_s1 + $0x50] sm:$0xff] (!%p277_p3)  ;;  %v356_v29 = vld [vmem:[%s1110_s1 + $0x58] sm:$0xff] (!%p277_p3)  ;;  %v831_v30 = vpack.c.bf16 (!%p277_p3), %v447_v26, %v446_v25  ;;  %v448_v31 = vld [vmem:[%s1112_s3 + $0x40] sm:$0xff] (!%p277_p3) }
   0xd   : > { %802 = vmatpush3.bf16.msra.mxu0 (!%p277_p3), %v801_v7  ;;  %v449_v32 = vld [vmem:[%s1112_s3 + $0x48] sm:$0xff] (!%p277_p3)  ;;  %v813_v33 = vpack.c.bf16 (!%p277_p3), %v356_v29, %v355_v28  ;;  %v357_v34 = vld [vmem:[%s1110_s1 + $0x60] sm:$0xff] (!%p277_p3)  ;;  %v450_v37 = vld [vmem:[%s1112_s3 + $0x50] sm:$0xff] (!%p277_p3) }
   0xe   : > { %803 = vmatprep.subr.bf16.mxu0 %v898_v3  ;;  %v358_v35 = vld [vmem:[%s1110_s1 + $0x68] sm:$0xff]  ;;  %v834_v36 = vpack.c.bf16 %v449_v32, %v448_v31  ;;  %s1122_s24 = smov (!%p318_p4, %s888_s24), 1  ;;  %v451_v38 = vld [vmem:[%s1112_s3 + $0x58] sm:$0xff]  ;;  %v359_v40 = vld [vmem:[%s1110_s1 + $0x70] sm:$0xff] }
   0xf   : > { %826 = vmatpush3.bf16.msra.mxu1 %v825_v18  ;;  %v816_v39 = vpack.c.bf16 %v358_v35, %v357_v34  ;;  %v360_v41 = vld [vmem:[%s1110_s1 + $0x78] sm:$0xff]  ;;  %v837_v42 = vpack.c.bf16 %v451_v38, %v450_v37  ;;  %s685_s23 = sshll.u32 %s1122_s24, 3  ;;  %v452_v43 = vld [vmem:[%s1112_s3 + $0x60] sm:$0xff]  ;;  %v453_v44 = vld [vmem:[%s1112_s3 + $0x68] sm:$0xff] }
  0x10   : > { %827 = vmatprep.subr.bf16.mxu1 %v898_v3  ;;  %v819_v45 = vpack.c.bf16 %v360_v41, %v359_v40  ;;  %s321_s11 = scalar_lea.vmem %s1109_s0, %s685_s23  ;;  %v840_v46 = vpack.c.bf16 %v453_v44, %v452_v43  ;;  %v454_v48 = vld [vmem:[%s1112_s3 + $0x70] sm:$0xff]  ;;  %v455_v49 = vld [vmem:[%s1112_s3 + $0x78] sm:$0xff]  ;;  %v687_v51 = vld [vmem:[%s1111_s2] ss:$0 sm:$0xff]  ;;  %s338_s8 = scalar_lea.vmem %s1116_s7, %s685_s23 }
  0x11   : > { %805 = vmatpush3.bf16.msra.mxu0 %v804_v15  ;;  %v344_v47 = vld [vmem:[%s321_s11] sm:$0xff]  ;;  %v843_v50 = vpack.c.bf16 %v455_v49, %v454_v48 }
  0x12   : > { %806 = vmatprep.subr.bf16.mxu0 %v898_v3  ;;  %v688_v56 = vld [vmem:[%s1113_s4] ss:$0 sm:$0xff] }
  0x13   : > { %829 = vmatpush3.bf16.msra.mxu1 %v828_v24  ;;  %v689_v8 = vld [vmem:[%s1114_s5] ss:$0 sm:$0xff] }
  0x14   : > { %830 = vmatprep.subr.bf16.mxu1 %v898_v3  ;;  %v690_v10 = vld [vmem:[%s1115_s6] ss:$0 sm:$0xff] }
  0x15   : > { %808 = vmatpush3.bf16.msra.mxu0 %v807_v21 }
  0x16   : > { %809 = vmatprep.subr.bf16.mxu0 %v898_v3 }
  0x17   : > { %832 = vmatpush3.bf16.msra.mxu1 %v831_v30 }
  0x18   : > { %833 = vmatprep.subr.bf16.mxu1 %v898_v3 }
  0x19   : > { %811 = vmatpush3.bf16.msra.mxu0 %v810_v27 }
  0x1a   : > { %812 = vmatprep.subr.bf16.mxu0 %v898_v3 }
  0x1b   : > { %835 = vmatpush3.bf16.msra.mxu1 %v834_v36 }
  0x1c   : > { %836 = vmatprep.subr.bf16.mxu1 %v898_v3 }
  0x1d   : > { %814 = vmatpush3.bf16.msra.mxu0 %v813_v33 }
  0x1e   : > { %815 = vmatprep.subr.bf16.mxu0 %v898_v3 }
  0x1f   : > { %838 = vmatpush3.bf16.msra.mxu1 %v837_v42 }
  0x20   : > { %839 = vmatprep.subr.bf16.mxu1 %v898_v3 }
  0x21   : > { %817 = vmatpush3.bf16.msra.mxu0 %v816_v39 }
  0x22   : > { %818 = vmatprep.subr.bf16.mxu0 %v898_v3 }
  0x23   : > { %841 = vmatpush3.bf16.msra.mxu1 %v840_v46 }
  0x24   : > { %842 = vmatprep.subr.bf16.mxu1 %v898_v3 }
  0x25   : > { %820 = vmatpush3.bf16.msra.mxu0 %v819_v45 }
  0x27   : > { %844 = vmatpush3.bf16.msra.mxu1 %v843_v50 }
  0x28   : > { %760 = vmatmul.mubr.f32.vlgmr.msra.gmra.mrb[0].mxu0 %v344_v47 }
  0xfb   : > { %v434_v52 = vpop.f32.mrb[0].mxu0 }
  0xfc   : > { %v435_v53 = vadd.f32 %v687_v51, %v434_v52  ;;  %v761_v54 = vpop.f32.mrb[1].mxu0 }
  0xfe   : > { %v438_v55 = vmax.f32 %v435_v53, 0.0 }
 0x100   : > { %795 = vmatmul.mubr.f32.vlgmr.msra.gmra.mrb[0].mxu1 %v438_v55 }
 0x1d3   : > { %v522_v57 = vpop.f32.mrb[0].mxu1 }
 0x1d4   : > { %v539_v58 = vadd.f32 %v688_v56, %v522_v57  ;;  %v796_v59 = vpop.f32.mrb[1].mxu1 }
 0x1d6   : > { %v540_v60 = vadd.f32 %v539_v58, %v344_v47 }
 0x1d8   : > { %541 = vadd.xlane.f32.xlu0 %v540_v60 }
 0x265   : > { %v542_v63 = vpop.xlane.xlu0 %541 }
 0x266   : > { %v543_v0 = vmul.f32 0.03125, %v542_v63 }
 0x268   : > { %v544_v1 = vsub.f32 %v540_v60, %v543_v0 }
 0x26a   : > { %v548_v2 = vsel %vm547_vm1, %v544_v1, 0.0 }
 0x26b   : > { %v549_v3 = vmul.f32 %v548_v2, %v548_v2 }
 0x26d   : > { %550 = vadd.xlane.f32.xlu0 %v549_v3 }
 0x2fa   : > { %v551_v4 = vpop.xlane.xlu0 %550 }
 0x2fb   : > { %v552_v5 = vmul.f32 0.03125, %v551_v4 }
 0x2fd   : > { %v553_v6 = vadd.f32 1e-06, %v552_v5 }
 0x2ff   : > { %872 = vrsqrt.f32 %v553_v6 }
 0x309   : > { %v873_v7 = vpop.eup %872 }
 0x30a   : > { %v555_v9 = vmul.f32 %v873_v7, %v548_v2 }
 0x30c   : > { %v563_v11 = vmul.f32 %v689_v8, %v555_v9 }
 0x30e   : > { %v571_v12 = vadd.f32 %v690_v10, %v563_v11 }
 0x310   : > { %572 = vst [vmem:[%s338_s8] sm:$0xff] %v571_v12 }
 0x311 PF: > { %s17_s26 = sadd.s32 1, %s896_s26   ;;  %s1117_s24 = smov %s892_s25 }
 0x312   : > { %p14_p5 = scmp.ge.s32.totalorder %s17_s26, 4   ;;  %s1118_s25 = smov %s1120_s27 }
 0x314   :  { %16 = sbr.rel (!%p14_p5) target bundleno = 2 (0x2), region = 95 }

</bundles_post_ra>
